<compile_context>
chip_gen: v7x
topology: tpu7x:2x2x1
jax: 0.10.0
libtpu: 0.0.40
codegen_flags: <defaults>
</compile_context>

<pallas_src>
import jax
import jax.numpy as jnp
from jax.experimental import pallas as pl
from jax.experimental.pallas import tpu as pltpu


_TARGET_BLOCK_BYTES = 4 * 1024 * 1024      # per-input block budget (4-8 MiB sweet spot)


def _vmem_cap_bytes() -> int:
    """~75% of this generation's physical VMEM (v5e/v6e 128 MiB, v7x 64 MiB)."""
    try:
        return int(0.75 * pltpu.get_tpu_info().vmem_capacity_bytes)
    except Exception:
        return 48 << 20        # conservative fallback, safe on every generation


def _choose_lanes(feat: int) -> int:
    """Lane width (last dim) for the flattened per-obs image.

    Prefer a multiple of 128 that also makes rows = feat // lanes a multiple
    of 8 (whole (8,128) tiles); else any multiple of 128 dividing feat; else
    the full image (rows == 1), which is always a legal full-dim block."""
    for k in range(16, 0, -1):             # 2048 .. 128
        lanes = 128 * k
        if feat % (8 * lanes) == 0:
            return lanes
    for k in range(16, 0, -1):
        lanes = 128 * k
        if feat % lanes == 0:
            return lanes
    return feat


def _choose_row_tile(rows: int, lanes: int, itemsize: int) -> int:
    """Largest multiple-of-8 divisor of `rows` within the byte budget.
    Must divide `rows` so the '+1 obs' block offset stays block-aligned.
    Falls back to `rows` itself (full-dim block, always tiling-legal)."""
    max_rows = max(8, _TARGET_BLOCK_BYTES // (lanes * itemsize))
    if rows <= max_rows:
        return rows
    best = rows
    for d in range(8, min(rows, max_rows) + 1, 8):
        if rows % d == 0:
            best = d
    return best


def _choose_batch_tile(bs: int, per_batch_block_bytes: int) -> int:
    """Batches per block: grow the block toward the byte budget, but keep at
    least two batch blocks so the parallel batch axis can feed both v7x TCs."""
    budget = max(1, _TARGET_BLOCK_BYTES // max(1, per_batch_block_bytes))
    cap = max(1, bs // 2)
    limit = max(1, min(budget, cap, bs))
    best = 1
    for d in range(1, limit + 1):
        if bs % d == 0:
            best = d
    return best


def _l1_partial_kernel(bg_ref, sh_ref, out_ref, acc_ref):
    """Accumulate sum(|bg - sh|) over the (obs, row) grid axes of one batch
    block; emit the per-batch-block partial sum once, in the last-step epilogue."""
    o = pl.program_id(1)
    r = pl.program_id(2)

    @pl.when((o == 0) & (r == 0))
    def _():
        acc_ref[...] = jnp.zeros_like(acc_ref)

    # Streamed abs-diff, widened to f32 for accumulation (bf16 inputs stay
    # bf16 on the wire, halving HBM bytes).
    d = jnp.abs(bg_ref[...].astype(jnp.float32) -
                sh_ref[...].astype(jnp.float32))         # (B_TILE, r_tile, lanes)
    p = d.sum(axis=0)                                    # fold batch slabs: VPU adds
    r_tile = p.shape[0]
    acc_rows, lanes = acc_ref.shape
    if r_tile != acc_rows:
        # Fold the row tile onto the 8-row accumulator; the reshape keeps whole
        # (8, lanes) sublane tiles intact so it is layout-free.
        p = p.reshape(r_tile // acc_rows, acc_rows, lanes).sum(axis=0)
    acc_ref[...] += p

    @pl.when((o == pl.num_programs(1) - 1) & (r == pl.num_programs(2) - 1))
    def _():
        # Single cross-lane reduce per batch block; broadcast the scalar into
        # an aligned (8,128) output tile (wrapper reads element [0,0]).
        out_ref[...] = jnp.full(out_ref.shape, jnp.sum(acc_ref[...]),
                                dtype=out_ref.dtype)


@jax.jit
def background_shift_loss(backgrounds: jax.Array,
                          shifted_backgrounds: jax.Array) -> jax.Array:
    """mean(|backgrounds[:, 1:] - shifted_backgrounds|) via a Pallas TPU kernel."""
    bs, num_obs, c, h, w = backgrounds.shape
    om1 = num_obs - 1
    assert om1 >= 1, "need at least two observations"
    assert shifted_backgrounds.shape == (bs, om1, c, h, w)

    feat = c * h * w
    lanes = _choose_lanes(feat)
    rows = feat // lanes                      # rows per observation image
    itemsize = jnp.dtype(backgrounds.dtype).itemsize

    r_tile = _choose_row_tile(rows, lanes, itemsize)
    n_r = rows // r_tile
    acc_rows = 8 if r_tile % 8 == 0 else r_tile

    b_tile = _choose_batch_tile(bs, r_tile * lanes * itemsize)
    n_bb = bs // b_tile

    # Contiguous (free) reshapes — no slice, no pad, no extra HBM passes.
    bg = backgrounds.reshape(bs, num_obs, rows, lanes)
    sh = shifted_backgrounds.reshape(bs, om1, rows, lanes)

    # Scoped-VMEM budget: 2 inputs x 2 pipeline buffers + accumulator + output
    # tile + slack, capped generation-aware (never above ~75% of physical VMEM;
    # v7x physical is 64 MiB per TC).
    block_bytes = b_tile * r_tile * lanes * itemsize
    vmem_needed = 4 * block_bytes + acc_rows * lanes * 4 + 2 * 8 * 128 * 4 + (2 << 20)
    vmem_limit = int(min(max(vmem_needed, 32 << 20),
                         max(_vmem_cap_bytes(), 32 << 20)))

    n_elems = bs * om1 * feat
    cost = pl.CostEstimate(
        flops=3 * n_elems,
        transcendentals=0,
        bytes_accessed=2 * n_elems * itemsize + n_bb * 8 * 128 * 4,
    )

    grid = (n_bb, om1, n_r)

    partial = pl.pallas_call(
        _l1_partial_kernel,
        out_shape=jax.ShapeDtypeStruct((n_bb, 8, 128), jnp.float32),
        grid_spec=pltpu.PrefetchScalarGridSpec(
            num_scalar_prefetch=0,
            grid=grid,
            in_specs=[
                # backgrounds[b-block, o + 1, r-block, :]: the "+1" in the
                # index_map replaces any wrapper-side backgrounds[:, 1:] copy.
                pl.BlockSpec((b_tile, None, r_tile, lanes),
                             lambda bb, o, r: (bb, o + 1, r, 0)),
                pl.BlockSpec((b_tile, None, r_tile, lanes),
                             lambda bb, o, r: (bb, o, r, 0)),
            ],
            out_specs=pl.BlockSpec((1, 8, 128), lambda bb, o, r: (bb, 0, 0)),
            scratch_shapes=[pltpu.VMEM((acc_rows, lanes), jnp.float32)],
        ),
        compiler_params=pltpu.CompilerParams(
            dimension_semantics=("parallel", "arbitrary", "arbitrary"),
            vmem_limit_bytes=vmem_limit,
        ),
        cost_estimate=cost,
    )(bg, sh)

    # Tiny final reduction over the per-batch-block partial sums.
    total = jnp.sum(partial[:, 0, 0])
    return total / jnp.float32(n_elems)       # exact element count; no padding


def _reference(backgrounds, shifted_backgrounds):
    return jnp.mean(jnp.abs(backgrounds[:, 1:] - shifted_backgrounds))


if __name__ == "__main__":
    key = jax.random.PRNGKey(0)
    k1, k2 = jax.random.split(key)

    bs, num_obs, c, h, w = 2, 4, 3, 16, 16
    backgrounds = jax.random.normal(k1, (bs, num_obs, c, h, w), jnp.float32)
    shifted_backgrounds = jax.random.normal(
        k2, (bs, num_obs - 1, c, h, w), jnp.float32)

    loss = background_shift_loss(backgrounds, shifted_backgrounds)
    loss = jax.block_until_ready(loss)

    ref = _reference(backgrounds, shifted_backgrounds)
    assert jnp.allclose(loss, ref, rtol=1e-5, atol=1e-6), (loss, ref)

    print("KERNEL_OK")
</pallas_src>

<mosaic_0001>
module attributes {stable_mosaic.version = 11 : i64} {
  func.func @_l1_partial_kernel(%arg0: i32, %arg1: i32, %arg2: i32, %arg3: memref<1x1x1x768xf32, #tpu.memory_space<vmem>>, %arg4: memref<1x1x1x768xf32, #tpu.memory_space<vmem>>, %arg5: memref<1x8x128xf32, #tpu.memory_space<vmem>>, %arg6: memref<1x768xf32, #tpu.memory_space<vmem>>) attributes {dimension_semantics = [#tpu.dimension_semantics<parallel>, #tpu.dimension_semantics<arbitrary>, #tpu.dimension_semantics<arbitrary>], iteration_bounds = array<i64: 2, 3, 1>, scalar_prefetch = 0 : i64, scratch_operands = 1 : i64, tpu.core_type = #tpu.core_type<tc>, window_params = [{transform_indices = @transform_0, window_bounds = array<i64: 1, 1, 1, 768>}, {transform_indices = @transform_1, window_bounds = array<i64: 1, 1, 1, 768>}, {transform_indices = @transform_2, window_bounds = array<i64: 1, 8, 128>}]} {
    %c0_i32 = arith.constant 0 : i32
    %0 = arith.cmpi eq, %arg1, %c0_i32 : i32
    %c0_i32_0 = arith.constant 0 : i32
    %1 = arith.cmpi eq, %arg2, %c0_i32_0 : i32
    %2 = arith.andi %0, %1 : i1
    %3 = arith.extui %2 : i1 to i32
    %c0_i32_1 = arith.constant 0 : i32
    %4 = arith.cmpi ne, %3, %c0_i32_1 : i32
    scf.if %4 {
      %cst_15 = arith.constant 0.000000e+00 : f32
      %20 = vector.broadcast %cst_15 : f32 to vector<1x768xf32>
      %c0_16 = arith.constant 0 : index
      %c0_17 = arith.constant 0 : index
      %21 = vector.load %arg6[%c0_16, %c0_17] : memref<1x768xf32, #tpu.memory_space<vmem>>, vector<1x768xf32>
      tpu.vector_store %arg6[%c0_16, %c0_17], %20 {strides = array<i32>} : memref<1x768xf32, #tpu.memory_space<vmem>>, vector<1x768xf32>,
    } else {
    }
    %c0 = arith.constant 0 : index
    %c0_2 = arith.constant 0 : index
    %c0_3 = arith.constant 0 : index
    %c0_4 = arith.constant 0 : index
    %5 = vector.load %arg3[%c0, %c0_2, %c0_3, %c0_4] : memref<1x1x1x768xf32, #tpu.memory_space<vmem>>, vector<1x1x1x768xf32>
    %6 = vector.shape_cast %5 : vector<1x1x1x768xf32> to vector<1x1x768xf32>
    %c0_5 = arith.constant 0 : index
    %c0_6 = arith.constant 0 : index
    %c0_7 = arith.constant 0 : index
    %c0_8 = arith.constant 0 : index
    %7 = vector.load %arg4[%c0_5, %c0_6, %c0_7, %c0_8] : memref<1x1x1x768xf32, #tpu.memory_space<vmem>>, vector<1x1x1x768xf32>
    %8 = vector.shape_cast %7 : vector<1x1x1x768xf32> to vector<1x1x768xf32>
    %9 = arith.subf %6, %8 : vector<1x1x768xf32>
    %10 = math.absf %9 : vector<1x1x768xf32>
    %cst = arith.constant dense<0.000000e+00> : vector<1x768xf32>
    %11 = vector.multi_reduction <add>, %10, %cst [0] : vector<1x1x768xf32> to vector<1x768xf32>
    %c0_9 = arith.constant 0 : index
    %c0_10 = arith.constant 0 : index
    %12 = vector.load %arg6[%c0_9, %c0_10] : memref<1x768xf32, #tpu.memory_space<vmem>>, vector<1x768xf32>
    %13 = arith.addf %12, %11 : vector<1x768xf32>
    %c0_11 = arith.constant 0 : index
    %c0_12 = arith.constant 0 : index
    %14 = vector.load %arg6[%c0_11, %c0_12] : memref<1x768xf32, #tpu.memory_space<vmem>>, vector<1x768xf32>
    tpu.vector_store %arg6[%c0_11, %c0_12], %13 {strides = array<i32>} : memref<1x768xf32, #tpu.memory_space<vmem>>, vector<1x768xf32>,
    %c2_i32 = arith.constant 2 : i32
    %15 = arith.cmpi eq, %arg1, %c2_i32 : i32
    %c0_i32_13 = arith.constant 0 : i32
    %16 = arith.cmpi eq, %arg2, %c0_i32_13 : i32
    %17 = arith.andi %15, %16 : i1
    %18 = arith.extui %17 : i1 to i32
    %c0_i32_14 = arith.constant 0 : i32
    %19 = arith.cmpi ne, %18, %c0_i32_14 : i32
    scf.if %19 {
      %c0_15 = arith.constant 0 : index
      %c0_16 = arith.constant 0 : index
      %20 = vector.load %arg6[%c0_15, %c0_16] : memref<1x768xf32, #tpu.memory_space<vmem>>, vector<1x768xf32>
      %21 = vector.shape_cast %20 : vector<1x768xf32> to vector<1x1x768xf32>
      %cst_17 = arith.constant dense<0.000000e+00> : vector<1xf32>
      %22 = vector.multi_reduction <add>, %21, %cst_17 [1, 2] : vector<1x1x768xf32> to vector<1xf32>
      %23 = vector.shape_cast %22 : vector<1xf32> to vector<1x1x1xf32>
      %24 = vector.extract %23[0, 0, 0] : f32 from vector<1x1x1xf32>
      %25 = vector.broadcast %24 : f32 to vector<1x8x128xf32>
      %c0_18 = arith.constant 0 : index
      %c0_19 = arith.constant 0 : index
      %c0_20 = arith.constant 0 : index
      %26 = vector.load %arg5[%c0_18, %c0_19, %c0_20] : memref<1x8x128xf32, #tpu.memory_space<vmem>>, vector<1x8x128xf32>
      tpu.vector_store %arg5[%c0_18, %c0_19, %c0_20], %25 {strides = array<i32>} : memref<1x8x128xf32, #tpu.memory_space<vmem>>, vector<1x8x128xf32>,
    } else {
    }
    return
  }
  func.func @transform_0(%arg0: i32, %arg1: i32, %arg2: i32) -> (i32, i32, i32, i32) {
    %c1_i32 = arith.constant 1 : i32
    %0 = arith.addi %arg1, %c1_i32 : i32
    %c0_i32 = arith.constant 0 : i32
    %c0_i32_0 = arith.constant 0 : i32
    return %arg0, %0, %arg2, %c0_i32 : i32, i32, i32, i32
  }
  func.func @transform_1(%arg0: i32, %arg1: i32, %arg2: i32) -> (i32, i32, i32, i32) {
    %c0_i32 = arith.constant 0 : i32
    %c0_i32_0 = arith.constant 0 : i32
    return %arg0, %arg1, %arg2, %c0_i32 : i32, i32, i32, i32
  }
  func.func @transform_2(%arg0: i32, %arg1: i32, %arg2: i32) -> (i32, i32, i32) {
    %c0_i32 = arith.constant 0 : i32
    %c0_i32_0 = arith.constant 0 : i32
    %c0_i32_1 = arith.constant 0 : i32
    return %arg0, %c0_i32, %c0_i32_0 : i32, i32, i32
  }
}

</mosaic_0001>

<bundles_post_ra>
// kernel: background_shift_loss.1
= control target key start
LH: loop header
LB: loop body
LE: loop exit
PB: predicated region body
PF: predicated region fallthrough
CT: control target
= control target key end

     0   :  { %s539_s9 = smov 0   ;;  %s541_s10 = smov 0   ;;  %s603_s0 = inlined_call_operand.vmem [shape: f32[2,4,1,768], index: 0, kind: input, shape index: {}]   ;;  %s604_s1 = inlined_call_operand.vmem [shape: f32[2,3,1,768], index: 1, kind: input, shape index: {}]   ;;  %s605_s2 = inlined_call_operand.vmem [shape: f32[2,8,128], index: 2, kind: output, shape index: {}]  }
   0x1   :  { %s543_s11 = smov 0   ;;  %s545_s12 = smov 0  }
   0x2   :  { %s547_s13 = smov 0  }
   0x3 LB: > { %s27_s14 = sadd.s32 1, %s513_s11  ;;  %s31_s15 = sadd.s32 1, %s517_s12  ;;  %s521_s13 = sphi %s547_s13, %s12_s13   ;;  %s517_s12 = sphi %s545_s12, %s609_s12   ;;  %s513_s11 = sphi %s543_s11, %s608_s11   ;;  %s509_s10 = sphi %s541_s10, %s607_s10   ;;  %s505_s9 = sphi %s539_s9, %s606_s9  }
   0x4   : > { %p29_p0 = scmp.ge.s32.totalorder %s27_s14, 3  ;;  %p428_p1 = scmp.ge.s32.totalorder %s521_s13, 1 }
   0x5   : > { %p167_p2 = scmp.lt.s32.totalorder %s521_s13, 7 }
   0x6   : > { %s611_s14 = smov (%p29_p0, %s27_s14), 0  ;;  %s613_s15 = smov (!%p29_p0, %s31_s15), %s517_s12 }
   0x7   : > { %p168_p3 = pnand %p428_p1, %p167_p2  ;;  %p33_p4 = scmp.ge.s32.totalorder %s613_s15, 2 }
   0x8   : > { %s208_s16 = sadd.s32 (!%p168_p3), 1, %s505_s9  ;;  %p209_p5 = scmp.lt.s32.totalorder (!%p168_p3), %s509_s10, 1 }
   0x9   : > { %s615_s15 = smov (%p33_p4, %s613_s15), 0  ;;  %171 = sbr.rel (%p168_p3) target bundleno = 264 (0x108), region = 28 }
   0xa   : > { %p211_p6 = scmp.lt.s32.totalorder (!%p168_p3), %s208_s16, 3  ;;  %p224_p7 = scmp.lt.s32.totalorder (!%p168_p3), %s505_s9, 2 }
   0xb   : > { %p238_p8 = scmp.eq.s32.totalorder (!%p168_p3), %s505_s9, 0 }
  0x10   : > { %s617_s10 = smov (!%p209_p5, %s509_s10), 1  ;;  %s619_s16 = smov (!%p211_p6, %s208_s16), 3 }
  0x11   : > { %s437_s17 = smul.u32 24, %s617_s10  ;;  %s429_s18 = sshll.u32 %s617_s10, 3  ;;  %v244_v0 = vlaneseq (%p238_p8)  ;;  %v523_v1 = vmov (%p238_p8), 0.0  }
  0x12   : > { %s436_s19 = smul.u32 6, %s619_s16  ;;  %s576_s22 = scalar_lea.vmem %s605_s2, %s429_s18 }
  0x13   : > { %s225_s23 = scalar_select %p224_p7, %s505_s9, 2 }
  0x14   : > { %s219_s24 = sadd.s32 %s437_s17, %s436_s19  ;;  %s439_s25 = smul.u32 18, %s617_s10  ;;  %vm246_vm0 = vcmp.lt.s32.totalorder (%p238_p8), %v244_v0, 768 }
  0x15   : > { %s220_s28 = scalar_lea.vmem %s603_s0, %s219_s24  ;;  %s438_s29 = smul.u32 6, %s225_s23  ;;  %248 = vst.msk [vmem:[#allocation2] sm:$0x3f] (%p238_p8), %vm246_vm0, %v523_v1 }
  0x16   : > { %243 = sbr.rel (!%p238_p8) target bundleno = 29 (0x1d), region = 32 }
  0x17   : > { %s232_s30 = sadd.s32 %s439_s25, %s438_s29 }
  0x18   : > { %s233_s5 = scalar_lea.vmem %s604_s1, %s232_s30 }
  0x1d PF: > { %v249_v2 = vld [vmem:[%s220_s28] sm:$0x3f]  ;;  %v256_v4 = vlaneseq  ;;  %p261_p9 = scmp.eq.s32.totalorder %s505_s9, 2 }
  0x1e   : > { %v250_v3 = vld [vmem:[%s233_s5] sm:$0x3f]  ;;  %vm298_vm2 = vcmask (%p261_p9), 1040384  }
  0x1f   : > { %v251_v5 = vsub.f32 %v249_v2, %v250_v3  ;;  %v254_v6 = vld [vmem:[#allocation2] sm:$0x3f]  ;;  %vm258_vm1 = vcmp.lt.s32.totalorder %v256_v4, 768  ;;  %265 = sbr.rel (!%p261_p9) target bundleno = 264 (0x108), region = 36  ;;  %v269_v9 = vshrl.u32 (%p261_p9), %v256_v4, 7 }
  0x21   : > { %v252_v7 = vand.u32 2147483647, %v251_v5  ;;  %v270_v11 = vsub.s32 (%p261_p9), 0, %v269_v9  ;;  %v274_v12 = vsub.s32 (%p261_p9), 1, %v269_v9  ;;  %v278_v13 = vsub.s32 (%p261_p9), 2, %v269_v9 }
  0x22   : > { %v282_v14 = vsub.s32 (%p261_p9), 3, %v269_v9  ;;  %v286_v15 = vsub.s32 (%p261_p9), 4, %v269_v9  ;;  %v290_v16 = vsub.s32 (%p261_p9), 5, %v269_v9 }
  0x23   : > { %v255_v8 = vadd.f32 %v254_v6, %v252_v7 }
  0x25   : > { %260 = vst.msk [vmem:[#allocation2] sm:$0x3f] %vm258_vm1, %v255_v8 }
  0x2c   : > { %v266_v10 = vld [vmem:[#allocation2] sm:$0x3f] }
  0x2d   : > { %v271_v17 = vrot.slane %v266_v10, %v270_v11  ;;  %v275_v18 = vrot.slane %v266_v10, %v274_v12  ;;  %v279_v19 = vrot.slane %v266_v10, %v278_v13  ;;  %v283_v20 = vrot.slane %v266_v10, %v282_v14 }
  0x2e   : > { %v287_v21 = vrot.slane %v266_v10, %v286_v15  ;;  %v291_v26 = vrot.slane %v266_v10, %v290_v16 }
  0x2f   : > { %v299_v22 = vsel %vm298_vm2, %v271_v17, 0.0  ;;  %v300_v23 = vsel %vm298_vm2, %v275_v18, 0.0  ;;  %v302_v24 = vsel %vm298_vm2, %v279_v19, 0.0  ;;  %v304_v27 = vsel %vm298_vm2, %v283_v20, 0.0 }
  0x30   : > { %v301_v25 = vadd.f32 %v300_v23, %v299_v22  ;;  %v306_v29 = vsel %vm298_vm2, %v287_v21, 0.0  ;;  %v308_v31 = vsel %vm298_vm2, %v291_v26, 0.0 }
  0x32   : > { %v303_v28 = vadd.f32 %v302_v24, %v301_v25 }
  0x34   : > { %v305_v30 = vadd.f32 %v304_v27, %v303_v28 }
  0x36   : > { %v307_v32 = vadd.f32 %v306_v29, %v305_v30 }
  0x38   : > { %v309_v33 = vadd.f32 %v308_v31, %v307_v32 }
  0x3a   : > { %310 = vadd.xlane.f32.xlu0 %v309_v33 }
  0xc7   : > { %v311_v34 = vpop.xlane.xlu0 %310 }
  0xc8   : > { %v312_v35 = vrot.slane %v311_v34, 4 }
  0xca   : > { %v313_v36 = vadd.f32 %v312_v35, %v311_v34 }
  0xcc   : > { %v314_v37 = vrot.slane %v313_v36, 2 }
  0xce   : > { %v315_v38 = vadd.f32 %v314_v37, %v313_v36 }
  0xd0   : > { %v316_v39 = vrot.slane %v315_v38, 1 }
  0xd2   : > { %v317_v40 = vadd.f32 %v316_v39, %v315_v38 }
  0xd4   : > { %440 = vpush %v317_v40 }
 0x105   : > { %s441_s6 = spop %440 }
 0x106   : > { %v319_v41 = vstv %s441_s6 }
 0x107   : > { %320 = vst [vmem:[%s576_s22] sm:$0xff] %v319_v41 }
 0x108 PF: > { %s12_s13 = sadd.s32 1, %s521_s13   ;;  %s606_s9 = smov %s513_s11 }
 0x109   : > { %p9_p10 = scmp.ge.s32.totalorder %s12_s13, 8   ;;  %s607_s10 = smov %s517_s12 }
 0x10a   : > { %s608_s11 = smov %s611_s14  ;;  %s609_s12 = smov %s615_s15 }
 0x10b   :  { %11 = sbr.rel (!%p9_p10) target bundleno = 3 (0x3), region = 69 }

</bundles_post_ra>
